<compile_context>
chip_gen: v6e
topology: v6e:2x2x1
jax: 0.10.0
libtpu: 0.0.40
codegen_flags: <defaults>
</compile_context>

<pallas_src>
import functools

import jax
import jax.numpy as jnp
from jax.experimental import pallas as pl
from jax.experimental.pallas import tpu as pltpu


# ---------------------------------------------------------------------------
# Kernels
# ---------------------------------------------------------------------------

def _dot_tb(a, b):
    """a:[m,k] x b:[n,k] -> [m,n]  (trans-B contraction on the MXU, f32 acc)."""
    return jax.lax.dot_general(
        a, b,
        dimension_numbers=(((1,), (1,)), ((), ())),
        preferred_element_type=jnp.float32,
    )


def _row_sq_norms(v_tile):
    """v_tile:[tn,tk] -> [1,tn] f32 partial row norms (sum over k of V^2).

    Computed as ones(1,tk) @ (V*V).T so the result lands lane-dense
    (directly broadcastable over the [tm,tn] logits tile) without any
    cross-lane transpose; the extra MXU work is ~1/tm of the main matmul.
    """
    v32 = v_tile.astype(jnp.float32)
    ones_row = jnp.ones((1, v_tile.shape[-1]), dtype=jnp.float32)
    return _dot_tb(ones_row, v32 * v32)


def ce_head_kernel_fused_k(x_ref, v_ref, g_ref, out_ref):
    """Single-K-step kernel: out tile = (x @ V.T) * g * rsqrt(sum_k V^2).

    Used when the whole contraction dim fits in one VMEM tile: no f32
    accumulator scratch, no k==0 / k==last branches, no RMW slot traffic.
    """
    acc = _dot_tb(x_ref[...], v_ref[...])                    # [tm, tn] f32
    inv_norm = jax.lax.rsqrt(_row_sq_norms(v_ref[...]))      # [1,  tn] f32
    scale = g_ref[...].astype(jnp.float32) * inv_norm
    out_ref[...] = (acc * scale).astype(out_ref.dtype)


def ce_head_kernel_multi_k(x_ref, v_ref, g_ref, out_ref, acc_ref, nrm_ref):
    """K-tiled kernel: accumulate logits and row norms across the k grid axis."""
    k = pl.program_id(2)

    @pl.when(k == 0)
    def _():
        acc_ref[...] = jnp.zeros_like(acc_ref)
        nrm_ref[...] = jnp.zeros_like(nrm_ref)

    acc_ref[...] += _dot_tb(x_ref[...], v_ref[...])
    nrm_ref[...] += _row_sq_norms(v_ref[...])

    @pl.when(k == pl.num_programs(2) - 1)
    def _():
        # Weight-norm scale applied once to the small logits tile.  All-zero
        # (padded) V rows would give rsqrt(0)=inf -> NaN, but such columns only
        # exist in the rare ragged-N fallback and are sliced away afterwards.
        scale = g_ref[...].astype(jnp.float32) * jax.lax.rsqrt(nrm_ref[...])
        out_ref[...] = (acc_ref[...] * scale).astype(out_ref.dtype)


# ---------------------------------------------------------------------------
# Tiling helpers
# ---------------------------------------------------------------------------

def _round_up(x, m):
    return ((x + m - 1) // m) * m


def _sublane(dtype):
    """Minimum sublane multiple for a dtype: 8 (f32) / 16 (bf16) / 32 (int8)."""
    return max(8, 32 // jnp.dtype(dtype).itemsize)


def _divisor_tile(dim, target, align):
    """Largest multiple of `align` <= target that divides `dim` (dim % align == 0)."""
    t = max(align, (min(target, dim) // align) * align)
    while t > align and dim % t != 0:
        t -= align
    return t


def _tile_and_pad(dim, target, align):
    """Pick a tile for `dim`; no padding whenever dim is already align-aligned."""
    padded = _round_up(dim, align)
    return _divisor_tile(padded, target, align), padded


# ---------------------------------------------------------------------------
# Wrapper
# ---------------------------------------------------------------------------

@functools.partial(jax.jit, static_argnames=("compute_dtype", "tm", "tn", "tk"))
def ce_head_forward(x, v, g, *, compute_dtype=None, tm=512, tn=512, tk=1024):
    """logits = x @ (g * V / ||V_row||_2).T   (weight_norm(dim=0) Linear, no bias).

    x: [B, in_dim], v (weight_v): [out_dim, in_dim], g (weight_g): [out_dim, 1].
    The weight-norm is fused into the matmul kernel so V is streamed from HBM
    exactly once.  Pass compute_dtype=jnp.bfloat16 for the fast path (native
    bf16 MXU, half the HBM bytes); accumulation / norms stay in f32.
    """
    B, in_dim = x.shape
    out_dim = v.shape[0]
    out_dtype = x.dtype

    if compute_dtype is not None:
        # One-time cast; ideally V is *stored* in compute_dtype already so this
        # is a no-op and V only ever moves through HBM once (inside the kernel).
        x = x.astype(compute_dtype)
        v = v.astype(compute_dtype)

    # g as a lane-dense [1, out_dim] f32 vector (tiny).
    g_row = jnp.asarray(g, jnp.float32).reshape(1, out_dim)

    xb = jnp.dtype(x.dtype).itemsize
    vb = jnp.dtype(v.dtype).itemsize
    ob = jnp.dtype(out_dtype).itemsize

    # --- tile selection -----------------------------------------------------
    # M: pad x rows (cheap; x is tiny next to V) to a dtype-aware sublane
    #    multiple.  Bigger tm => fewer full HBM passes over V.
    sub_m = max(_sublane(x.dtype), _sublane(out_dtype))
    tm = min(_round_up(tm, sub_m), _round_up(B, sub_m))
    Mp = _round_up(B, tm)

    # N: never pad/copy V when out_dim is 128-aligned (vocab sizes usually are).
    tn, Np = _tile_and_pad(out_dim, tn, 128)

    # K: collapse the K grid axis entirely when the double-buffered tiles still
    #    fit comfortably in VMEM (drops accumulator RMW + k branches);
    #    otherwise use a K-tiled reduction.
    Kp_full = _round_up(in_dim, 128)
    if 2 * Kp_full * (tm * xb + tn * vb) <= 20 * 1024 * 1024:
        tk, Kp = Kp_full, Kp_full
    else:
        tk, Kp = _tile_and_pad(in_dim, tk, 128)

    # --- (rare) ragged-shape fallback padding --------------------------------
    if Mp != B or Kp != in_dim:
        x = jnp.pad(x, ((0, Mp - B), (0, Kp - in_dim)))
    if Np != out_dim or Kp != in_dim:
        v = jnp.pad(v, ((0, Np - out_dim), (0, Kp - in_dim)))
    if Np != out_dim:
        g_row = jnp.pad(g_row, ((0, 0), (0, Np - out_dim)), constant_values=1.0)

    grid_m, grid_n, grid_k = Mp // tm, Np // tn, Kp // tk

    cost = pl.CostEstimate(
        flops=2 * Mp * Np * Kp + 2 * grid_m * Np * Kp,    # matmul + fused norms
        transcendentals=grid_m * Np,                       # rsqrt per logits tile
        bytes_accessed=Mp * Kp * xb + grid_m * Np * Kp * vb + Mp * Np * ob,
    )

    # VMEM budget: double-buffered inputs/outputs + accumulator scratch, with
    # headroom; clamped to what is safe on every generation (v7x has 64 MiB).
    buf_bytes = 2 * (tm * tk * xb + tn * tk * vb + tn * 4 + tm * tn * ob)
    scratch_bytes = tm * tn * 4 + tn * 4
    vmem_limit = int(min(max(2 * (buf_bytes + scratch_bytes), 32 << 20), 64 << 20))

    if grid_k == 1:
        out = pl.pallas_call(
            ce_head_kernel_fused_k,
            out_shape=jax.ShapeDtypeStruct((Mp, Np), out_dtype),
            grid_spec=pltpu.PrefetchScalarGridSpec(
                num_scalar_prefetch=0,
                grid=(grid_m, grid_n),
                in_specs=[
                    pl.BlockSpec((tm, Kp), lambda i, j: (i, 0)),   # x
                    pl.BlockSpec((tn, Kp), lambda i, j: (j, 0)),   # V (trans-B)
                    pl.BlockSpec((1, tn), lambda i, j: (0, j)),    # g
                ],
                out_specs=pl.BlockSpec((tm, tn), lambda i, j: (i, j)),
            ),
            compiler_params=pltpu.CompilerParams(
                dimension_semantics=("parallel", "parallel"),
                vmem_limit_bytes=vmem_limit,
            ),
            cost_estimate=cost,
        )(x, v, g_row)
    else:
        out = pl.pallas_call(
            ce_head_kernel_multi_k,
            out_shape=jax.ShapeDtypeStruct((Mp, Np), out_dtype),
            grid_spec=pltpu.PrefetchScalarGridSpec(
                num_scalar_prefetch=0,
                grid=(grid_m, grid_n, grid_k),
                in_specs=[
                    pl.BlockSpec((tm, tk), lambda i, j, k: (i, k)),  # x
                    pl.BlockSpec((tn, tk), lambda i, j, k: (j, k)),  # V (trans-B)
                    pl.BlockSpec((1, tn), lambda i, j, k: (0, j)),   # g
                ],
                out_specs=pl.BlockSpec((tm, tn), lambda i, j, k: (i, j)),
                scratch_shapes=[
                    pltpu.VMEM((tm, tn), jnp.float32),   # logits accumulator
                    pltpu.VMEM((1, tn), jnp.float32),    # row-norm accumulator
                ],
            ),
            compiler_params=pltpu.CompilerParams(
                dimension_semantics=("parallel", "parallel", "arbitrary"),
                vmem_limit_bytes=vmem_limit,
            ),
            cost_estimate=cost,
        )(x, v, g_row)

    if Mp != B or Np != out_dim:
        out = out[:B, :out_dim]
    return out


# ---------------------------------------------------------------------------
# Demo / correctness check
# ---------------------------------------------------------------------------

if __name__ == "__main__":
    # Small, deterministic synthetic setup (no checkpoint loading).
    B, in_dim, out_dim = 16, 256, 512

    key = jax.random.PRNGKey(0)
    kx, kv = jax.random.split(key)

    x = jax.random.normal(kx, (B, in_dim), dtype=jnp.float32)
    # weight_v: synthetic stand-in for trunc_normal_(std=0.02) init.
    v = jax.random.normal(kv, (out_dim, in_dim), dtype=jnp.float32) * 0.02
    # weight_g: filled with 1 as in the module's __init__.
    g = jnp.ones((out_dim, 1), dtype=jnp.float32)

    # Plain-JAX reference of the exact module math.
    w_eff = v * (g / jnp.sqrt(jnp.sum(v * v, axis=1, keepdims=True)))
    ref = x @ w_eff.T

    # f32 path (matches the PyTorch module's dtype).
    logits = ce_head_forward(x, v, g)
    jax.block_until_ready(logits)
    assert logits.shape == (B, out_dim)
    assert jnp.allclose(logits, ref, atol=1e-3, rtol=1e-3)

    # bf16 fast path (half the HBM bytes, native bf16 MXU; f32 accumulation and
    # f32 weight-norm inside the kernel).
    logits_bf16 = ce_head_forward(x, v, g, compute_dtype=jnp.bfloat16)
    jax.block_until_ready(logits_bf16)
    assert logits_bf16.shape == (B, out_dim)
    assert jnp.allclose(logits_bf16.astype(jnp.float32), ref, atol=5e-2, rtol=5e-2)

    print("KERNEL_OK")
</pallas_src>

<mosaic_0001>
module attributes {stable_mosaic.version = 11 : i64} {
  func.func @ce_head_kernel_fused_k(%arg0: i32, %arg1: i32, %arg2: memref<16x256xf32, #tpu.memory_space<vmem>>, %arg3: memref<512x256xf32, #tpu.memory_space<vmem>>, %arg4: memref<1x512xf32, #tpu.memory_space<vmem>>, %arg5: memref<16x512xf32, #tpu.memory_space<vmem>>) attributes {dimension_semantics = [#tpu.dimension_semantics<parallel>, #tpu.dimension_semantics<parallel>], iteration_bounds = array<i64: 1, 1>, scalar_prefetch = 0 : i64, scratch_operands = 0 : i64, tpu.core_type = #tpu.core_type<tc>, window_params = [{transform_indices = @transform_0, window_bounds = array<i64: 16, 256>}, {transform_indices = @transform_1, window_bounds = array<i64: 512, 256>}, {transform_indices = @transform_2, window_bounds = array<i64: 1, 512>}, {transform_indices = @transform_3, window_bounds = array<i64: 16, 512>}]} {
    %c0 = arith.constant 0 : index
    %c0_0 = arith.constant 0 : index
    %0 = vector.load %arg2[%c0, %c0_0] : memref<16x256xf32, #tpu.memory_space<vmem>>, vector<16x256xf32>
    %c0_1 = arith.constant 0 : index
    %c0_2 = arith.constant 0 : index
    %1 = vector.load %arg3[%c0_1, %c0_2] : memref<512x256xf32, #tpu.memory_space<vmem>>, vector<512x256xf32>
    %cst = arith.constant dense<0.000000e+00> : vector<16x512xf32>
    %2 = tpu.matmul %0, %1, %cst {dimension_numbers = #tpu.dot_dimension_numbers<[1], [1], [0], [0], [0, 0, 1, 0], [], []>} : vector<16x256xf32>, vector<512x256xf32>, vector<16x512xf32> -> vector<16x512xf32>
    %c0_3 = arith.constant 0 : index
    %c0_4 = arith.constant 0 : index
    %3 = vector.load %arg3[%c0_3, %c0_4] : memref<512x256xf32, #tpu.memory_space<vmem>>, vector<512x256xf32>
    %cst_5 = arith.constant 1.000000e+00 : f32
    %4 = vector.broadcast %cst_5 : f32 to vector<1x256xf32>
    %5 = arith.mulf %3, %3 : vector<512x256xf32>
    %cst_6 = arith.constant dense<0.000000e+00> : vector<1x512xf32>
    %6 = tpu.matmul %4, %5, %cst_6 {dimension_numbers = #tpu.dot_dimension_numbers<[1], [1], [0], [0], [0, 0, 1, 0], [], []>} : vector<1x256xf32>, vector<512x256xf32>, vector<1x512xf32> -> vector<1x512xf32>
    %7 = math.rsqrt %6 : vector<1x512xf32>
    %c0_7 = arith.constant 0 : index
    %c0_8 = arith.constant 0 : index
    %8 = vector.load %arg4[%c0_7, %c0_8] : memref<1x512xf32, #tpu.memory_space<vmem>>, vector<1x512xf32>
    %9 = arith.mulf %8, %7 : vector<1x512xf32>
    %10 = vector.broadcast %9 : vector<1x512xf32> to vector<16x512xf32>
    %11 = arith.mulf %2, %10 : vector<16x512xf32>
    %c0_9 = arith.constant 0 : index
    %c0_10 = arith.constant 0 : index
    %12 = vector.load %arg5[%c0_9, %c0_10] : memref<16x512xf32, #tpu.memory_space<vmem>>, vector<16x512xf32>
    tpu.vector_store %arg5[%c0_9, %c0_10], %11 {strides = array<i32>} : memref<16x512xf32, #tpu.memory_space<vmem>>, vector<16x512xf32>,
    return
  }
  func.func @transform_0(%arg0: i32, %arg1: i32) -> (i32, i32) {
    %c0_i32 = arith.constant 0 : i32
    %c0_i32_0 = arith.constant 0 : i32
    return %arg0, %c0_i32 : i32, i32
  }
  func.func @transform_1(%arg0: i32, %arg1: i32) -> (i32, i32) {
    %c0_i32 = arith.constant 0 : i32
    %c0_i32_0 = arith.constant 0 : i32
    return %arg1, %c0_i32 : i32, i32
  }
  func.func @transform_2(%arg0: i32, %arg1: i32) -> (i32, i32) {
    %c0_i32 = arith.constant 0 : i32
    %c0_i32_0 = arith.constant 0 : i32
    return %c0_i32, %arg1 : i32, i32
  }
  func.func @transform_3(%arg0: i32, %arg1: i32) -> (i32, i32) {
    %c0_i32 = arith.constant 0 : i32
    return %arg0, %arg1 : i32, i32
  }
}

</mosaic_0001>

<bundles_post_ra>
// kernel: ce_head_forward.1
= control target key start
LH: loop header
LB: loop body
LE: loop exit
PB: predicated region body
PF: predicated region fallthrough
CT: control target
= control target key end

     0   :  { %8 = vsyncpa [#allocation3], 0  ;;  %s1457_s0 = inlined_call_operand.hbm [shape: f32[16,256], index: 0, kind: input, shape index: {}]   ;;  %s1458_s1 = inlined_call_operand.hbm [shape: f32[512,256], index: 1, kind: input, shape index: {}]   ;;  %s1459_s2 = inlined_call_operand.vmem [shape: f32[1,512], index: 2, kind: input, shape index: {}]   ;;  %s1460_s3 = inlined_call_operand.hbm [shape: f32[16,512], index: 3, kind: output, shape index: {}]  }
   0x1   :  { %9 = vsyncpa [#allocation6], 0 }
   0x2   :  { %10 = vsyncpa [#allocation4], 0  ;;  %s772_s12 = smov [#allocation2]  }
   0x3   :  { %s16_s13 = sshll.u32 %s772_s12, 4  ;;  %s17_s13 = int_to_ptr.vmem [resolvable:$true] %s16_s13 }
   0x4   :  { %s714_s14 = scalar_lea.vmem %s17_s13, 512  ;;  %p719_p1 = scmp.lt.s32.totalorder %s17_s13, %s17_s13 }
   0x5   :  { %p715_p0 = scmp.ne.s32.totalorder %s17_s13, %s714_s14  ;;  %p720_p2 = scmp.lt.s32.totalorder %s714_s14, %s714_s14 }
   0x7   :  { %p721_p3 = por %p720_p2, %p719_p1 }
   0x9   :  { %p722_p4 = pnand %p721_p3, %p715_p0 }
   0xb   :  { %725 = shalt.err (!%p722_p4)
}
   0xc   :  { %s773_s15 = smov 256   ;;  %s774_s16 = smov 16  }
   0xd   :  { %22 = dma.hbm_to_vmem [thread:$0]  %s1457_s0, 512, %s17_s13, [#allocation3], %s773_s15, %s773_s15, %s774_s16  }
   0xe   :  { %s775_s19 = smov [#allocation5]  }
   0xf   :  { %s28_s20 = sshll.u32 %s775_s19, 4  ;;  %s29_s20 = int_to_ptr.vmem [resolvable:$true] %s28_s20 }
  0x10   :  { %s734_s21 = scalar_lea.vmem %s29_s20, 16384  ;;  %p739_p6 = scmp.lt.s32.totalorder %s29_s20, %s29_s20 }
  0x11   :  { %p735_p5 = scmp.ne.s32.totalorder %s29_s20, %s734_s21  ;;  %p740_p7 = scmp.lt.s32.totalorder %s734_s21, %s734_s21 }
  0x13   :  { %p741_p8 = por %p740_p7, %p739_p6 }
  0x15   :  { %p742_p9 = pnand %p741_p8, %p735_p5 }
  0x17   :  { %745 = shalt.err (!%p742_p9)
}
  0x18   :  { %34 = dma.hbm_to_vmem [thread:$0]  %s1458_s1, 16384, %s29_s20, [#allocation6], %s773_s15, %s773_s15, %s774_s16  }
  0x19   :  { %766 = dma.done.wait [#allocation3], 512  }
  0x1a   :  { %767 = vsyncadd [#allocation3], 4294966784 }
  0x1b   :  { %768 = dma.done.wait [#allocation6], 16384  }
  0x1c   :  { %769 = vsyncadd [#allocation6], 4294950912  ;;  %v807_v0 = vld [vmem:[#allocation5 + $0xf8] sm:$0xff]  ;;  %v811_v2 = vld [vmem:[#allocation5 + $0xf0] sm:$0xff]  ;;  %s778_s24 = smov [#allocation7]  }
  0x1d   :  { %v809_v1 = vld [vmem:[#allocation5 + $0x2f8] sm:$0xff]  ;;  %175 = vmatprep.subr.mxu0 %v807_v0  ;;  %v815_v3 = vld [vmem:[#allocation5 + $0x2f0] sm:$0xff]  ;;  %v817_v4 = vld [vmem:[#allocation5 + $0xe8] sm:$0xff]  ;;  %s676_s25 = sshll.u32 %s778_s24, 4  ;;  %s677_s25 = int_to_ptr.vmem [resolvable:$true] %s676_s25 }
  0x1e   :  { %252 = vmatprep.subr.mxu1 %v809_v1  ;;  %v819_v5 = vld [vmem:[#allocation5 + $0x2e8] sm:$0xff]  ;;  %176 = vmatpush1.xpose.msra.mxu0 %v811_v2  ;;  %v825_v6 = vld [vmem:[#allocation5 + $0xe0] sm:$0xff]  ;;  %v829_v8 = vld [vmem:[#allocation5 + $0xd8] sm:$0xff]  ;;  %p751_p11 = scmp.lt.s32.totalorder %s677_s25, %s677_s25 }
  0x1f   :  { %253 = vmatpush1.xpose.msra.mxu1 %v815_v3  ;;  %177 = vmatprep.subr.mxu0 %v817_v4  ;;  %v827_v7 = vld [vmem:[#allocation5 + $0x2e0] sm:$0xff]  ;;  %v831_v9 = vld [vmem:[#allocation5 + $0x2d8] sm:$0xff]  ;;  %v837_v10 = vld [vmem:[#allocation5 + $0xd0] sm:$0xff] }
  0x20   :  { %254 = vmatprep.subr.mxu1 %v819_v5  ;;  %v839_v11 = vld [vmem:[#allocation5 + $0x2d0] sm:$0xff]  ;;  %v841_v12 = vld [vmem:[#allocation5 + $0xc8] sm:$0xff]  ;;  %v849_v14 = vld [vmem:[#allocation5 + $0xc0] sm:$0xff] }
  0x21   :  { %v843_v13 = vld [vmem:[#allocation5 + $0x2c8] sm:$0xff]  ;;  %v851_v15 = vld [vmem:[#allocation5 + $0x2c0] sm:$0xff]  ;;  %v853_v16 = vld [vmem:[#allocation5 + $0xb8] sm:$0xff] }
  0x22   :  { %178 = vmatpush1.xpose.msra.mxu0 %v825_v6  ;;  %v855_v17 = vld [vmem:[#allocation5 + $0x2b8] sm:$0xff]  ;;  %v861_v18 = vld [vmem:[#allocation5 + $0xb0] sm:$0xff]  ;;  %v865_v20 = vld [vmem:[#allocation5 + $0xa8] sm:$0xff] }
  0x23   :  { %255 = vmatpush1.xpose.msra.mxu1 %v827_v7  ;;  %179 = vmatprep.subr.mxu0 %v829_v8  ;;  %v863_v19 = vld [vmem:[#allocation5 + $0x2b0] sm:$0xff]  ;;  %v867_v21 = vld [vmem:[#allocation5 + $0x2a8] sm:$0xff]  ;;  %v873_v22 = vld [vmem:[#allocation5 + $0xa0] sm:$0xff] }
  0x24   :  { %256 = vmatprep.subr.mxu1 %v831_v9  ;;  %v875_v23 = vld [vmem:[#allocation5 + $0x2a0] sm:$0xff]  ;;  %v877_v24 = vld [vmem:[#allocation5 + $0x98] sm:$0xff]  ;;  %v885_v26 = vld [vmem:[#allocation5 + $0x90] sm:$0xff] }
  0x25   :  { %v879_v25 = vld [vmem:[#allocation5 + $0x298] sm:$0xff]  ;;  %v887_v27 = vld [vmem:[#allocation5 + $0x290] sm:$0xff]  ;;  %v889_v28 = vld [vmem:[#allocation5 + $0x88] sm:$0xff] }
  0x26   :  { %180 = vmatpush1.xpose.msra.mxu0 %v837_v10  ;;  %v891_v29 = vld [vmem:[#allocation5 + $0x288] sm:$0xff]  ;;  %v897_v30 = vld [vmem:[#allocation5 + $0x80] sm:$0xff]  ;;  %v901_v32 = vld [vmem:[#allocation5 + $0x78] sm:$0xff] }
  0x27   :  { %257 = vmatpush1.xpose.msra.mxu1 %v839_v11  ;;  %181 = vmatprep.subr.mxu0 %v841_v12  ;;  %v899_v31 = vld [vmem:[#allocation5 + $0x280] sm:$0xff]  ;;  %v903_v33 = vld [vmem:[#allocation5 + $0x278] sm:$0xff]  ;;  %v909_v34 = vld [vmem:[#allocation5 + $0x70] sm:$0xff] }
  0x28   :  { %258 = vmatprep.subr.mxu1 %v843_v13  ;;  %v911_v35 = vld [vmem:[#allocation5 + $0x270] sm:$0xff]  ;;  %v913_v36 = vld [vmem:[#allocation5 + $0x68] sm:$0xff]  ;;  %v921_v38 = vld [vmem:[#allocation5 + $0x60] sm:$0xff] }
  0x29   :  { %v915_v37 = vld [vmem:[#allocation5 + $0x268] sm:$0xff]  ;;  %v923_v39 = vld [vmem:[#allocation5 + $0x260] sm:$0xff]  ;;  %v925_v40 = vld [vmem:[#allocation5 + $0x58] sm:$0xff] }
  0x2a   :  { %182 = vmatpush1.xpose.msra.mxu0 %v849_v14  ;;  %v927_v41 = vld [vmem:[#allocation5 + $0x258] sm:$0xff]  ;;  %v933_v42 = vld [vmem:[#allocation5 + $0x50] sm:$0xff]  ;;  %v937_v44 = vld [vmem:[#allocation5 + $0x48] sm:$0xff] }
  0x2b   :  { %259 = vmatpush1.xpose.msra.mxu1 %v851_v15  ;;  %183 = vmatprep.subr.mxu0 %v853_v16  ;;  %v935_v43 = vld [vmem:[#allocation5 + $0x250] sm:$0xff]  ;;  %v939_v45 = vld [vmem:[#allocation5 + $0x248] sm:$0xff]  ;;  %v945_v47 = vld [vmem:[#allocation5 + $0x40] sm:$0xff] }
  0x2c   :  { %260 = vmatprep.subr.mxu1 %v855_v17  ;;  %v44_v46 = vld [vmem:[#allocation2 + $0x8] sm:$0xff]  ;;  %v947_v48 = vld [vmem:[#allocation5 + $0x240] sm:$0xff]  ;;  %v949_v49 = vld [vmem:[#allocation5 + $0x38] sm:$0xff] }
  0x2d   :  { %v951_v50 = vld [vmem:[#allocation5 + $0x238] sm:$0xff]  ;;  %239 = vmatprep.mubr.f32.mxu0 %v44_v46  ;;  %316 = vmatprep.mubr.f32.mxu1 %v44_v46  ;;  %v957_v51 = vld [vmem:[#allocation5 + $0x30] sm:$0xff]  ;;  %v961_v53 = vld [vmem:[#allocation5 + $0x28] sm:$0xff] }
  0x2e   :  { %184 = vmatpush1.xpose.msra.mxu0 %v861_v18  ;;  %v959_v52 = vld [vmem:[#allocation5 + $0x230] sm:$0xff]  ;;  %v963_v54 = vld [vmem:[#allocation5 + $0x228] sm:$0xff]  ;;  %v969_v55 = vld [vmem:[#allocation5 + $0x20] sm:$0xff] }
  0x2f   :  { %261 = vmatpush1.xpose.msra.mxu1 %v863_v19  ;;  %185 = vmatprep.subr.mxu0 %v865_v20  ;;  %v971_v56 = vld [vmem:[#allocation5 + $0x220] sm:$0xff]  ;;  %v973_v57 = vld [vmem:[#allocation5 + $0x18] sm:$0xff]  ;;  %v981_v59 = vld [vmem:[#allocation5 + $0x10] sm:$0xff] }
  0x30   :  { %262 = vmatprep.subr.mxu1 %v867_v21  ;;  %1532 = vst [vmem:[#allocation11_spill] sm:$0xff] %v971_v56  ;;  %1533 = vst [vmem:[#allocation12_spill] sm:$0xff] %v973_v57  ;;  %v975_v58 = vld [vmem:[#allocation5 + $0x218] sm:$0xff]  ;;  %v983_v60 = vld [vmem:[#allocation5 + $0x210] sm:$0xff] }
  0x31   :  { %1534 = vst [vmem:[#allocation13_spill] sm:$0xff] %v975_v58  ;;  %1535 = vst [vmem:[#allocation14_spill] sm:$0xff] %v981_v59  ;;  %v985_v61 = vld [vmem:[#allocation5 + $0x8] sm:$0xff]  ;;  %v993_v63 = vld [vmem:[#allocation5] sm:$0xff] }
  0x32   :  { %186 = vmatpush1.xpose.msra.mxu0 %v873_v22  ;;  %1536 = vst [vmem:[#allocation15_spill] sm:$0xff] %v983_v60  ;;  %1537 = vst [vmem:[#allocation16_spill] sm:$0xff] %v985_v61  ;;  %v987_v62 = vld [vmem:[#allocation5 + $0x208] sm:$0xff]  ;;  %v995_v46 = vld [vmem:[#allocation5 + $0x200] sm:$0xff] }
  0x33   :  { %263 = vmatpush1.xpose.msra.mxu1 %v875_v23  ;;  %187 = vmatprep.subr.mxu0 %v877_v24  ;;  %1538 = vst [vmem:[#allocation17_spill] sm:$0xff] %v987_v62  ;;  %1539 = vst [vmem:[#allocation18_spill] sm:$0xff] %v993_v63 }
  0x34   :  { %264 = vmatprep.subr.mxu1 %v879_v25  ;;  %1540 = vst [vmem:[#allocation19_spill] sm:$0xff] %v995_v46 }
  0x36   :  { %188 = vmatpush1.xpose.msra.mxu0 %v885_v26 }
  0x37   :  { %265 = vmatpush1.xpose.msra.mxu1 %v887_v27  ;;  %189 = vmatprep.subr.mxu0 %v889_v28 }
  0x38   :  { %266 = vmatprep.subr.mxu1 %v891_v29 }
  0x3a   :  { %190 = vmatpush1.xpose.msra.mxu0 %v897_v30 }
  0x3b   :  { %267 = vmatpush1.xpose.msra.mxu1 %v899_v31  ;;  %191 = vmatprep.subr.mxu0 %v901_v32 }
  0x3c   :  { %268 = vmatprep.subr.mxu1 %v903_v33 }
  0x3e   :  { %192 = vmatpush1.xpose.msra.mxu0 %v909_v34 }
  0x3f   :  { %269 = vmatpush1.xpose.msra.mxu1 %v911_v35  ;;  %193 = vmatprep.subr.mxu0 %v913_v36 }
  0x40   :  { %270 = vmatprep.subr.mxu1 %v915_v37 }
  0x42   :  { %194 = vmatpush1.xpose.msra.mxu0 %v921_v38 }
  0x43   :  { %271 = vmatpush1.xpose.msra.mxu1 %v923_v39  ;;  %195 = vmatprep.subr.mxu0 %v925_v40 }
  0x44   :  { %272 = vmatprep.subr.mxu1 %v927_v41 }
  0x46   :  { %196 = vmatpush1.xpose.msra.mxu0 %v933_v42 }
  0x47   :  { %273 = vmatpush1.xpose.msra.mxu1 %v935_v43  ;;  %197 = vmatprep.subr.mxu0 %v937_v44 }
  0x48   :  { %274 = vmatprep.subr.mxu1 %v939_v45 }
  0x4a   :  { %198 = vmatpush1.xpose.msra.mxu0 %v945_v47 }
  0x4b   :  { %275 = vmatpush1.xpose.msra.mxu1 %v947_v48  ;;  %199 = vmatprep.subr.mxu0 %v949_v49 }
  0x4c   :  { %276 = vmatprep.subr.mxu1 %v951_v50 }
  0x4e   :  { %200 = vmatpush1.xpose.msra.mxu0 %v957_v51 }
  0x4f   :  { %277 = vmatpush1.xpose.msra.mxu1 %v959_v52  ;;  %201 = vmatprep.subr.mxu0 %v961_v53 }
  0x50   :  { %278 = vmatprep.subr.mxu1 %v963_v54 }
  0x52   :  { %202 = vmatpush1.xpose.msra.mxu0 %v969_v55 }
  0x53   :  { %279 = vmatpush1.xpose.msra.mxu1 %v971_v56  ;;  %203 = vmatprep.subr.mxu0 %v973_v57  ;;  %v999_v57 = vld [vmem:[#allocation5 + $0x3f8] sm:$0xff]  ;;  %v359_v56 = vmul.f32 %v811_v2, %v811_v2  ;;  %v357_v2 = vmul.f32 %v825_v6, %v825_v6  ;;  %v355_v6 = vmul.f32 %v837_v10, %v837_v10 }
  0x54   :  { %280 = vmatprep.subr.mxu1 %v975_v58  ;;  %v997_v58 = vld [vmem:[#allocation5 + $0x1f8] sm:$0xff]  ;;  %1542 = vst [vmem:[#allocation21_spill] sm:$0xff] %v999_v57  ;;  %v353_v10 = vmul.f32 %v849_v14, %v849_v14  ;;  %v350_v14 = vmul.f32 %v865_v20, %v865_v20  ;;  %v347_v20 = vmul.f32 %v885_v26, %v885_v26 }
  0x55   :  { %1541 = vst [vmem:[#allocation20_spill] sm:$0xff] %v997_v58  ;;  %v344_v26 = vmul.f32 %v901_v32, %v901_v32  ;;  %v341_v32 = vmul.f32 %v921_v38, %v921_v38  ;;  %v338_v38 = vmul.f32 %v937_v44, %v937_v44  ;;  %v335_v44 = vmul.f32 %v957_v51, %v957_v51  ;;  %v1604_v51 = vld [vmem:[#allocation12_spill] sm:$0xff] }
  0x56   :  { %204 = vmatpush1.xpose.msra.mxu0 %v981_v59  ;;  %v1011_v59 = vld [vmem:[#allocation5 + $0x3e8] sm:$0xff] }
  0x57   :  { %281 = vmatpush1.xpose.msra.mxu1 %v983_v60  ;;  %205 = vmatprep.subr.mxu0 %v985_v61  ;;  %v1005_v60 = vld [vmem:[#allocation5 + $0x1f0] sm:$0xff]  ;;  %1546 = vst [vmem:[#allocation25_spill] sm:$0xff] %v1011_v59 }
  0x58   :  { %282 = vmatprep.subr.mxu1 %v987_v62  ;;  %1543 = vst [vmem:[#allocation22_spill] sm:$0xff] %v1005_v60  ;;  %v1007_v61 = vld [vmem:[#allocation5 + $0x3f0] sm:$0xff]  ;;  %v1009_v62 = vld [vmem:[#allocation5 + $0x1e8] sm:$0xff] }
  0x59   :  { %1544 = vst [vmem:[#allocation23_spill] sm:$0xff] %v1007_v61  ;;  %1545 = vst [vmem:[#allocation24_spill] sm:$0xff] %v1009_v62 }
  0x5a   :  { %206 = vmatpush1.xpose.msra.mxu0 %v993_v63  ;;  %v1023_v63 = vld [vmem:[#allocation5 + $0x3d8] sm:$0xff] }
  0x5b   :  { %283 = vmatpush1.xpose.msra.mxu1 %v995_v46  ;;  %207 = vmatprep.subr.mxu0 %v997_v58  ;;  %v1017_v46 = vld [vmem:[#allocation5 + $0x1e0] sm:$0xff]  ;;  %1550 = vst [vmem:[#allocation29_spill] sm:$0xff] %v1023_v63 }
  0x5c   :  { %284 = vmatprep.subr.mxu1 %v999_v57  ;;  %1547 = vst [vmem:[#allocation26_spill] sm:$0xff] %v1017_v46  ;;  %v1019_v58 = vld [vmem:[#allocation5 + $0x3e0] sm:$0xff]  ;;  %v1021_v57 = vld [vmem:[#allocation5 + $0x1d8] sm:$0xff] }
  0x5d   :  { %1548 = vst [vmem:[#allocation27_spill] sm:$0xff] %v1019_v58  ;;  %1549 = vst [vmem:[#allocation28_spill] sm:$0xff] %v1021_v57 }
  0x5e   :  { %208 = vmatpush2.xpose.msra.mxu0 %v1005_v60  ;;  %v1035_v60 = vld [vmem:[#allocation5 + $0x3c8] sm:$0xff] }
  0x5f   :  { %285 = vmatpush2.xpose.msra.mxu1 %v1007_v61  ;;  %209 = vmatprep.subr.mxu0 %v1009_v62  ;;  %v1029_v61 = vld [vmem:[#allocation5 + $0x1d0] sm:$0xff]  ;;  %1554 = vst [vmem:[#allocation33_spill] sm:$0xff] %v1035_v60 }
  0x60   :  { %286 = vmatprep.subr.mxu1 %v1011_v59  ;;  %1551 = vst [vmem:[#allocation30_spill] sm:$0xff] %v1029_v61  ;;  %v1031_v62 = vld [vmem:[#allocation5 + $0x3d0] sm:$0xff]  ;;  %v1033_v59 = vld [vmem:[#allocation5 + $0x1c8] sm:$0xff] }
  0x61   :  { %1552 = vst [vmem:[#allocation31_spill] sm:$0xff] %v1031_v62  ;;  %1553 = vst [vmem:[#allocation32_spill] sm:$0xff] %v1033_v59 }
  0x62   :  { %210 = vmatpush2.xpose.msra.mxu0 %v1017_v46  ;;  %v1047_v46 = vld [vmem:[#allocation5 + $0x3b8] sm:$0xff] }
  0x63   :  { %287 = vmatpush2.xpose.msra.mxu1 %v1019_v58  ;;  %211 = vmatprep.subr.mxu0 %v1021_v57  ;;  %v1041_v58 = vld [vmem:[#allocation5 + $0x1c0] sm:$0xff]  ;;  %1558 = vst [vmem:[#allocation37_spill] sm:$0xff] %v1047_v46 }
  0x64   :  { %288 = vmatprep.subr.mxu1 %v1023_v63  ;;  %1555 = vst [vmem:[#allocation34_spill] sm:$0xff] %v1041_v58  ;;  %v1043_v57 = vld [vmem:[#allocation5 + $0x3c0] sm:$0xff]  ;;  %v1045_v63 = vld [vmem:[#allocation5 + $0x1b8] sm:$0xff] }
  0x65   :  { %1556 = vst [vmem:[#allocation35_spill] sm:$0xff] %v1043_v57  ;;  %1557 = vst [vmem:[#allocation36_spill] sm:$0xff] %v1045_v63 }
  0x66   :  { %212 = vmatpush2.xpose.msra.mxu0 %v1029_v61  ;;  %v1059_v61 = vld [vmem:[#allocation5 + $0x3a8] sm:$0xff] }
  0x67   :  { %289 = vmatpush2.xpose.msra.mxu1 %v1031_v62  ;;  %213 = vmatprep.subr.mxu0 %v1033_v59  ;;  %v1053_v62 = vld [vmem:[#allocation5 + $0x1b0] sm:$0xff]  ;;  %1562 = vst [vmem:[#allocation41_spill] sm:$0xff] %v1059_v61 }
  0x68   :  { %290 = vmatprep.subr.mxu1 %v1035_v60  ;;  %1559 = vst [vmem:[#allocation38_spill] sm:$0xff] %v1053_v62  ;;  %v1055_v59 = vld [vmem:[#allocation5 + $0x3b0] sm:$0xff]  ;;  %v1057_v60 = vld [vmem:[#allocation5 + $0x1a8] sm:$0xff] }
  0x69   :  { %1560 = vst [vmem:[#allocation39_spill] sm:$0xff] %v1055_v59  ;;  %1561 = vst [vmem:[#allocation40_spill] sm:$0xff] %v1057_v60 }
  0x6a   :  { %214 = vmatpush2.xpose.msra.mxu0 %v1041_v58  ;;  %v1071_v58 = vld [vmem:[#allocation5 + $0x398] sm:$0xff] }
  0x6b   :  { %291 = vmatpush2.xpose.msra.mxu1 %v1043_v57  ;;  %215 = vmatprep.subr.mxu0 %v1045_v63  ;;  %v1065_v57 = vld [vmem:[#allocation5 + $0x1a0] sm:$0xff]  ;;  %1566 = vst [vmem:[#allocation45_spill] sm:$0xff] %v1071_v58 }
  0x6c   :  { %292 = vmatprep.subr.mxu1 %v1047_v46  ;;  %1563 = vst [vmem:[#allocation42_spill] sm:$0xff] %v1065_v57  ;;  %v1067_v63 = vld [vmem:[#allocation5 + $0x3a0] sm:$0xff]  ;;  %v1069_v46 = vld [vmem:[#allocation5 + $0x198] sm:$0xff] }
  0x6d   :  { %1564 = vst [vmem:[#allocation43_spill] sm:$0xff] %v1067_v63  ;;  %1565 = vst [vmem:[#allocation44_spill] sm:$0xff] %v1069_v46 }
  0x6e   :  { %216 = vmatpush2.xpose.msra.mxu0 %v1053_v62  ;;  %v1083_v62 = vld [vmem:[#allocation5 + $0x388] sm:$0xff] }
  0x6f   :  { %293 = vmatpush2.xpose.msra.mxu1 %v1055_v59  ;;  %217 = vmatprep.subr.mxu0 %v1057_v60  ;;  %v1077_v59 = vld [vmem:[#allocation5 + $0x190] sm:$0xff]  ;;  %1570 = vst [vmem:[#allocation49_spill] sm:$0xff] %v1083_v62 }
  0x70   :  { %294 = vmatprep.subr.mxu1 %v1059_v61  ;;  %1567 = vst [vmem:[#allocation46_spill] sm:$0xff] %v1077_v59  ;;  %v1079_v60 = vld [vmem:[#allocation5 + $0x390] sm:$0xff]  ;;  %v1081_v61 = vld [vmem:[#allocation5 + $0x188] sm:$0xff] }
  0x71   :  { %1568 = vst [vmem:[#allocation47_spill] sm:$0xff] %v1079_v60  ;;  %1569 = vst [vmem:[#allocation48_spill] sm:$0xff] %v1081_v61 }
  0x72   :  { %218 = vmatpush2.xpose.msra.mxu0 %v1065_v57  ;;  %v1095_v57 = vld [vmem:[#allocation5 + $0x378] sm:$0xff] }
  0x73   :  { %295 = vmatpush2.xpose.msra.mxu1 %v1067_v63  ;;  %219 = vmatprep.subr.mxu0 %v1069_v46  ;;  %v1089_v63 = vld [vmem:[#allocation5 + $0x180] sm:$0xff]  ;;  %1574 = vst [vmem:[#allocation53_spill] sm:$0xff] %v1095_v57 }
  0x74   :  { %296 = vmatprep.subr.mxu1 %v1071_v58  ;;  %1571 = vst [vmem:[#allocation50_spill] sm:$0xff] %v1089_v63  ;;  %v1091_v46 = vld [vmem:[#allocation5 + $0x380] sm:$0xff]  ;;  %v1093_v58 = vld [vmem:[#allocation5 + $0x178] sm:$0xff] }
  0x75   :  { %1572 = vst [vmem:[#allocation51_spill] sm:$0xff] %v1091_v46  ;;  %1573 = vst [vmem:[#allocation52_spill] sm:$0xff] %v1093_v58 }
  0x76   :  { %220 = vmatpush2.xpose.msra.mxu0 %v1077_v59  ;;  %v1107_v59 = vld [vmem:[#allocation5 + $0x368] sm:$0xff] }
  0x77   :  { %297 = vmatpush2.xpose.msra.mxu1 %v1079_v60  ;;  %221 = vmatprep.subr.mxu0 %v1081_v61  ;;  %v1101_v60 = vld [vmem:[#allocation5 + $0x170] sm:$0xff]  ;;  %1578 = vst [vmem:[#allocation57_spill] sm:$0xff] %v1107_v59 }
  0x78   :  { %298 = vmatprep.subr.mxu1 %v1083_v62  ;;  %1575 = vst [vmem:[#allocation54_spill] sm:$0xff] %v1101_v60  ;;  %v1103_v61 = vld [vmem:[#allocation5 + $0x370] sm:$0xff]  ;;  %v1105_v62 = vld [vmem:[#allocation5 + $0x168] sm:$0xff] }
  0x79   :  { %1576 = vst [vmem:[#allocation55_spill] sm:$0xff] %v1103_v61  ;;  %1577 = vst [vmem:[#allocation56_spill] sm:$0xff] %v1105_v62 }
  0x7a   :  { %222 = vmatpush2.xpose.msra.mxu0 %v1089_v63  ;;  %v1119_v63 = vld [vmem:[#allocation5 + $0x358] sm:$0xff] }
  0x7b   :  { %299 = vmatpush2.xpose.msra.mxu1 %v1091_v46  ;;  %223 = vmatprep.subr.mxu0 %v1093_v58  ;;  %v1113_v46 = vld [vmem:[#allocation5 + $0x160] sm:$0xff]  ;;  %1582 = vst [vmem:[#allocation61_spill] sm:$0xff] %v1119_v63 }
  0x7c   :  { %300 = vmatprep.subr.mxu1 %v1095_v57  ;;  %1579 = vst [vmem:[#allocation58_spill] sm:$0xff] %v1113_v46  ;;  %v1115_v58 = vld [vmem:[#allocation5 + $0x360] sm:$0xff]  ;;  %v1117_v57 = vld [vmem:[#allocation5 + $0x158] sm:$0xff] }
  0x7d   :  { %1580 = vst [vmem:[#allocation59_spill] sm:$0xff] %v1115_v58  ;;  %1581 = vst [vmem:[#allocation60_spill] sm:$0xff] %v1117_v57 }
  0x7e   :  { %224 = vmatpush2.xpose.msra.mxu0 %v1101_v60  ;;  %v1131_v60 = vld [vmem:[#allocation5 + $0x348] sm:$0xff] }
  0x7f   :  { %301 = vmatpush2.xpose.msra.mxu1 %v1103_v61  ;;  %225 = vmatprep.subr.mxu0 %v1105_v62  ;;  %v1125_v61 = vld [vmem:[#allocation5 + $0x150] sm:$0xff]  ;;  %1586 = vst [vmem:[#allocation65_spill] sm:$0xff] %v1131_v60 }
  0x80   :  { %302 = vmatprep.subr.mxu1 %v1107_v59  ;;  %1583 = vst [vmem:[#allocation62_spill] sm:$0xff] %v1125_v61  ;;  %v1127_v62 = vld [vmem:[#allocation5 + $0x350] sm:$0xff]  ;;  %v1129_v59 = vld [vmem:[#allocation5 + $0x148] sm:$0xff] }
  0x81   :  { %1584 = vst [vmem:[#allocation63_spill] sm:$0xff] %v1127_v62  ;;  %1585 = vst [vmem:[#allocation64_spill] sm:$0xff] %v1129_v59 }
  0x82   :  { %226 = vmatpush2.xpose.msra.mxu0 %v1113_v46  ;;  %v1143_v46 = vld [vmem:[#allocation5 + $0x338] sm:$0xff] }
  0x83   :  { %303 = vmatpush2.xpose.msra.mxu1 %v1115_v58  ;;  %227 = vmatprep.subr.mxu0 %v1117_v57  ;;  %v1137_v58 = vld [vmem:[#allocation5 + $0x140] sm:$0xff]  ;;  %1590 = vst [vmem:[#allocation69_spill] sm:$0xff] %v1143_v46 }
  0x84   :  { %304 = vmatprep.subr.mxu1 %v1119_v63  ;;  %1587 = vst [vmem:[#allocation66_spill] sm:$0xff] %v1137_v58  ;;  %v1139_v57 = vld [vmem:[#allocation5 + $0x340] sm:$0xff]  ;;  %v1141_v63 = vld [vmem:[#allocation5 + $0x138] sm:$0xff] }
  0x85   :  { %1588 = vst [vmem:[#allocation67_spill] sm:$0xff] %v1139_v57  ;;  %1589 = vst [vmem:[#allocation68_spill] sm:$0xff] %v1141_v63 }
  0x86   :  { %228 = vmatpush2.xpose.msra.mxu0 %v1125_v61  ;;  %v1155_v61 = vld [vmem:[#allocation5 + $0x328] sm:$0xff] }
  0x87   :  { %305 = vmatpush2.xpose.msra.mxu1 %v1127_v62  ;;  %229 = vmatprep.subr.mxu0 %v1129_v59  ;;  %v1149_v62 = vld [vmem:[#allocation5 + $0x130] sm:$0xff]  ;;  %1594 = vst [vmem:[#allocation73_spill] sm:$0xff] %v1155_v61 }
  0x88   :  { %306 = vmatprep.subr.mxu1 %v1131_v60  ;;  %1591 = vst [vmem:[#allocation70_spill] sm:$0xff] %v1149_v62  ;;  %v1151_v59 = vld [vmem:[#allocation5 + $0x330] sm:$0xff]  ;;  %v1153_v60 = vld [vmem:[#allocation5 + $0x128] sm:$0xff] }
  0x89   :  { %1592 = vst [vmem:[#allocation71_spill] sm:$0xff] %v1151_v59  ;;  %1593 = vst [vmem:[#allocation72_spill] sm:$0xff] %v1153_v60 }
  0x8a   :  { %230 = vmatpush2.xpose.msra.mxu0 %v1137_v58  ;;  %v1167_v58 = vld [vmem:[#allocation5 + $0x318] sm:$0xff] }
  0x8b   :  { %307 = vmatpush2.xpose.msra.mxu1 %v1139_v57  ;;  %231 = vmatprep.subr.mxu0 %v1141_v63  ;;  %v1161_v57 = vld [vmem:[#allocation5 + $0x120] sm:$0xff]  ;;  %1598 = vst [vmem:[#allocation77_spill] sm:$0xff] %v1167_v58 }
  0x8c   :  { %308 = vmatprep.subr.mxu1 %v1143_v46  ;;  %1595 = vst [vmem:[#allocation74_spill] sm:$0xff] %v1161_v57  ;;  %v1163_v63 = vld [vmem:[#allocation5 + $0x320] sm:$0xff]  ;;  %v1165_v46 = vld [vmem:[#allocation5 + $0x118] sm:$0xff] }
  0x8d   :  { %1596 = vst [vmem:[#allocation75_spill] sm:$0xff] %v1163_v63  ;;  %1597 = vst [vmem:[#allocation76_spill] sm:$0xff] %v1165_v46 }
  0x8e   :  { %232 = vmatpush2.xpose.msra.mxu0 %v1149_v62  ;;  %v1179_v62 = vld [vmem:[#allocation5 + $0x308] sm:$0xff] }
  0x8f   :  { %309 = vmatpush2.xpose.msra.mxu1 %v1151_v59  ;;  %233 = vmatprep.subr.mxu0 %v1153_v60  ;;  %v1173_v59 = vld [vmem:[#allocation5 + $0x110] sm:$0xff]  ;;  %1601 = vst [vmem:[#allocation80_spill] sm:$0xff] %v1179_v62 }
  0x90   :  { %310 = vmatprep.subr.mxu1 %v1155_v61  ;;  %v1175_v60 = vld [vmem:[#allocation5 + $0x310] sm:$0xff]  ;;  %v1177_v61 = vld [vmem:[#allocation5 + $0x108] sm:$0xff] }
  0x91   :  { %1599 = vst [vmem:[#allocation78_spill] sm:$0xff] %v1175_v60  ;;  %1600 = vst [vmem:[#allocation79_spill] sm:$0xff] %v1177_v61 }
  0x92   :  { %234 = vmatpush2.xpose.msra.mxu0 %v1161_v57  ;;  %v360_v57 = vmul.f32 %v807_v0, %v807_v0  ;;  %v43_v0 = vld [vmem:[#allocation2] sm:$0xff] }
  0x93   :  { %311 = vmatpush2.xpose.msra.mxu1 %v1163_v63  ;;  %235 = vmatprep.subr.mxu0 %v1165_v46  ;;  %v424_v46 = vmul.f32 %v809_v1, %v809_v1  ;;  %v1191_v63 = vld [vmem:[#allocation5 + $0x300] sm:$0xff]  ;;  %v358_v1 = vmul.f32 %v817_v4, %v817_v4  ;;  %v356_v4 = vmul.f32 %v829_v8, %v829_v8 }
  0x94   :  { %312 = vmatprep.subr.mxu1 %v1167_v58  ;;  %v1189_v58 = vld [vmem:[#allocation5 + $0x100] sm:$0xff]  ;;  %1602 = vst [vmem:[#allocation81_spill] sm:$0xff] %v1191_v63  ;;  %v354_v8 = vmul.f32 %v841_v12, %v841_v12  ;;  %v352_v12 = vmul.f32 %v853_v16, %v853_v16  ;;  %v349_v16 = vmul.f32 %v873_v22, %v873_v22 }
  0x95   :  { %v346_v22 = vmul.f32 %v889_v28, %v889_v28  ;;  %v343_v28 = vmul.f32 %v909_v34, %v909_v34  ;;  %v340_v34 = vmul.f32 %v925_v40, %v925_v40  ;;  %v337_v40 = vmul.f32 %v945_v47, %v945_v47 }
  0x96   :  { %236 = vmatpush2.xpose.msra.mxu0 %v1173_v59  ;;  %v334_v47 = vmul.f32 %v961_v53, %v961_v53  ;;  %v1606_v53 = vld [vmem:[#allocation14_spill] sm:$0xff] }
  0x97   :  { %313 = vmatpush2.xpose.msra.mxu1 %v1175_v60  ;;  %237 = vmatprep.subr.mxu0 %v1177_v61  ;;  %v423_v60 = vmul.f32 %v815_v3, %v815_v3  ;;  %v46_v61 = vld [vmem:[#allocation2 + $0x18] sm:$0xff]  ;;  %v421_v3 = vmul.f32 %v827_v7, %v827_v7  ;;  %v419_v7 = vmul.f32 %v839_v11, %v839_v11 }
  0x98   :  { %314 = vmatprep.subr.mxu1 %v1179_v62  ;;  %v422_v62 = vmul.f32 %v819_v5, %v819_v5  ;;  %v420_v5 = vmul.f32 %v831_v9, %v831_v9  ;;  %v418_v9 = vmul.f32 %v843_v13, %v843_v13  ;;  %v417_v11 = vmul.f32 %v851_v15, %v851_v15 }
  0x99   :  { %v416_v13 = vmul.f32 %v855_v17, %v855_v17  ;;  %v414_v15 = vmul.f32 %v867_v21, %v867_v21  ;;  %v413_v17 = vmul.f32 %v875_v23, %v875_v23  ;;  %v411_v21 = vmul.f32 %v887_v27, %v887_v27 }
  0x9a   :  { %238 = vmatpush2.xpose.msra.mxu0 %v1189_v58  ;;  %v410_v23 = vmul.f32 %v891_v29, %v891_v29  ;;  %v408_v27 = vmul.f32 %v903_v33, %v903_v33  ;;  %v407_v29 = vmul.f32 %v911_v35, %v911_v35  ;;  %v405_v33 = vmul.f32 %v923_v39, %v923_v39 }
  0x9b   :  { %315 = vmatpush2.xpose.msra.mxu1 %v1191_v63  ;;  %457 = vmatprep.subr.mxu0 %v360_v57  ;;  %v45_v63 = vld [vmem:[#allocation2 + $0x10] sm:$0xff]  ;;  %v351_v57 = vmul.f32 %v861_v18, %v861_v18  ;;  %v348_v18 = vmul.f32 %v877_v24, %v877_v24  ;;  %v345_v24 = vmul.f32 %v897_v30, %v897_v30 }
  0x9c   :  { %528 = vmatprep.subr.mxu1 %v424_v46  ;;  %v342_v30 = vmul.f32 %v913_v36, %v913_v36  ;;  %v404_v35 = vmul.f32 %v927_v41, %v927_v41  ;;  %v339_v36 = vmul.f32 %v933_v42, %v933_v42  ;;  %v402_v39 = vmul.f32 %v939_v45, %v939_v45  ;;  %v1607_v46 = vld [vmem:[#allocation15_spill] sm:$0xff] }
  0x9d   :  { %240 = vmatmul.mubr.f32.vlgmr.msra.gmra.mxu0 %v43_v0  ;;  %v401_v41 = vmul.f32 %v947_v48, %v947_v48  ;;  %v336_v42 = vmul.f32 %v949_v49, %v949_v49  ;;  %v399_v45 = vmul.f32 %v959_v52, %v959_v52  ;;  %v398_v48 = vmul.f32 %v963_v54, %v963_v54 }
  0x9e   :  { %317 = vmatmul.mubr.f32.vlgmr.msra.gmra.mxu1 %v43_v0  ;;  %458 = vmatpush1.xpose.msra.mxu0 %v359_v56  ;;  %v776_v56 = vmov 1.0   ;;  %v333_v49 = vmul.f32 %v969_v55, %v969_v55  ;;  %v332_v52 = vmul.f32 %v1604_v51, %v1604_v51  ;;  %v331_v54 = vmul.f32 %v1606_v53, %v1606_v53  ;;  %v1608_v55 = vld [vmem:[#allocation16_spill] sm:$0xff] }
  0x9f   :  { %529 = vmatpush1.xpose.msra.mxu1 %v423_v60  ;;  %459 = vmatprep.subr.mxu0 %v358_v1  ;;  %v415_v60 = vmul.f32 %v863_v19, %v863_v19  ;;  %v412_v19 = vmul.f32 %v879_v25, %v879_v25  ;;  %v409_v25 = vmul.f32 %v899_v31, %v899_v31 }
  0xa0   :  { %530 = vmatprep.subr.mxu1 %v422_v62  ;;  %245 = vmatprep.mubr.f32.mxu0 %v46_v61  ;;  %v406_v31 = vmul.f32 %v915_v37, %v915_v37  ;;  %v403_v37 = vmul.f32 %v935_v43, %v935_v43  ;;  %v400_v43 = vmul.f32 %v951_v50, %v951_v50  ;;  %v1603_v50 = vld [vmem:[#allocation11_spill] sm:$0xff]  ;;  %v1605_v62 = vld [vmem:[#allocation13_spill] sm:$0xff] }
  0xa1   :  { %322 = vmatprep.mubr.f32.mxu1 %v46_v61  ;;  %246 = vmatmul.mubr.f32.gmra.mxu0 %v45_v63  ;;  %v397_v61 = vmul.f32 %v1603_v50, %v1603_v50  ;;  %v395_v0 = vmul.f32 %v1607_v46, %v1607_v46  ;;  %v330_v1 = vmul.f32 %v1608_v55, %v1608_v55 }
  0xa2   :  { %323 = vmatmul.mubr.f32.gmra.mxu1 %v45_v63  ;;  %460 = vmatpush1.xpose.msra.mxu0 %v357_v2  ;;  %v396_v63 = vmul.f32 %v1605_v62, %v1605_v62  ;;  %v1609_v2 = vld [vmem:[#allocation17_spill] sm:$0xff] }
  0xa3   :  { %531 = vmatpush1.xpose.msra.mxu1 %v421_v3  ;;  %461 = vmatprep.subr.mxu0 %v356_v4  ;;  %v394_v3 = vmul.f32 %v1609_v2, %v1609_v2  ;;  %v1610_v4 = vld [vmem:[#allocation18_spill] sm:$0xff] }
  0xa4   :  { %532 = vmatprep.subr.mxu1 %v420_v5  ;;  %521 = vmatprep.mubr.f32.mxu0 %v776_v56  ;;  %v329_v5 = vmul.f32 %v1610_v4, %v1610_v4 }
  0xa5   :  { %592 = vmatprep.mubr.f32.mxu1 %v776_v56 }
  0xa6   :  { %462 = vmatpush1.xpose.msra.mxu0 %v355_v6  ;;  %v1611_v6 = vld [vmem:[#allocation19_spill] sm:$0xff] }
  0xa7   :  { %533 = vmatpush1.xpose.msra.mxu1 %v419_v7  ;;  %463 = vmatprep.subr.mxu0 %v354_v8  ;;  %v393_v7 = vmul.f32 %v1611_v6, %v1611_v6  ;;  %v1612_v8 = vld [vmem:[#allocation20_spill] sm:$0xff] }
  0xa8   :  { %534 = vmatprep.subr.mxu1 %v418_v9  ;;  %v392_v9 = vmul.f32 %v1612_v8, %v1612_v8 }
  0xaa   :  { %464 = vmatpush1.xpose.msra.mxu0 %v353_v10  ;;  %v1613_v10 = vld [vmem:[#allocation21_spill] sm:$0xff] }
  0xab   :  { %535 = vmatpush1.xpose.msra.mxu1 %v417_v11  ;;  %465 = vmatprep.subr.mxu0 %v352_v12  ;;  %v456_v11 = vmul.f32 %v1613_v10, %v1613_v10  ;;  %v1614_v12 = vld [vmem:[#allocation22_spill] sm:$0xff] }
  0xac   :  { %536 = vmatprep.subr.mxu1 %v416_v13  ;;  %v391_v13 = vmul.f32 %v1614_v12, %v1614_v12 }
  0xae   :  { %466 = vmatpush1.xpose.msra.mxu0 %v351_v57  ;;  %v1615_v57 = vld [vmem:[#allocation23_spill] sm:$0xff] }
  0xaf   :  { %537 = vmatpush1.xpose.msra.mxu1 %v415_v60  ;;  %467 = vmatprep.subr.mxu0 %v350_v14  ;;  %v455_v60 = vmul.f32 %v1615_v57, %v1615_v57  ;;  %v1616_v14 = vld [vmem:[#allocation24_spill] sm:$0xff] }
  0xb0   :  { %538 = vmatprep.subr.mxu1 %v414_v15  ;;  %v390_v15 = vmul.f32 %v1616_v14, %v1616_v14 }
  0xb2   :  { %468 = vmatpush1.xpose.msra.mxu0 %v349_v16  ;;  %v1617_v16 = vld [vmem:[#allocation25_spill] sm:$0xff] }
  0xb3   :  { %539 = vmatpush1.xpose.msra.mxu1 %v413_v17  ;;  %469 = vmatprep.subr.mxu0 %v348_v18  ;;  %v454_v17 = vmul.f32 %v1617_v16, %v1617_v16  ;;  %v1618_v18 = vld [vmem:[#allocation26_spill] sm:$0xff] }
  0xb4   :  { %540 = vmatprep.subr.mxu1 %v412_v19  ;;  %v389_v19 = vmul.f32 %v1618_v18, %v1618_v18 }
  0xb6   :  { %470 = vmatpush1.xpose.msra.mxu0 %v347_v20  ;;  %v1619_v20 = vld [vmem:[#allocation27_spill] sm:$0xff] }
  0xb7   :  { %541 = vmatpush1.xpose.msra.mxu1 %v411_v21  ;;  %471 = vmatprep.subr.mxu0 %v346_v22  ;;  %v453_v21 = vmul.f32 %v1619_v20, %v1619_v20  ;;  %v1620_v22 = vld [vmem:[#allocation28_spill] sm:$0xff] }
  0xb8   :  { %542 = vmatprep.subr.mxu1 %v410_v23  ;;  %v388_v23 = vmul.f32 %v1620_v22, %v1620_v22 }
  0xba   :  { %472 = vmatpush1.xpose.msra.mxu0 %v345_v24  ;;  %v1621_v24 = vld [vmem:[#allocation29_spill] sm:$0xff] }
  0xbb   :  { %543 = vmatpush1.xpose.msra.mxu1 %v409_v25  ;;  %473 = vmatprep.subr.mxu0 %v344_v26  ;;  %v452_v25 = vmul.f32 %v1621_v24, %v1621_v24  ;;  %v1622_v26 = vld [vmem:[#allocation30_spill] sm:$0xff] }
  0xbc   :  { %544 = vmatprep.subr.mxu1 %v408_v27  ;;  %v387_v27 = vmul.f32 %v1622_v26, %v1622_v26 }
  0xbe   :  { %474 = vmatpush1.xpose.msra.mxu0 %v343_v28  ;;  %v1623_v28 = vld [vmem:[#allocation31_spill] sm:$0xff] }
  0xbf   :  { %545 = vmatpush1.xpose.msra.mxu1 %v407_v29  ;;  %475 = vmatprep.subr.mxu0 %v342_v30  ;;  %v451_v29 = vmul.f32 %v1623_v28, %v1623_v28  ;;  %v1624_v30 = vld [vmem:[#allocation32_spill] sm:$0xff] }
  0xc0   :  { %546 = vmatprep.subr.mxu1 %v406_v31  ;;  %v386_v31 = vmul.f32 %v1624_v30, %v1624_v30 }
  0xc2   :  { %476 = vmatpush1.xpose.msra.mxu0 %v341_v32  ;;  %v1625_v32 = vld [vmem:[#allocation33_spill] sm:$0xff] }
  0xc3   :  { %547 = vmatpush1.xpose.msra.mxu1 %v405_v33  ;;  %477 = vmatprep.subr.mxu0 %v340_v34  ;;  %v450_v33 = vmul.f32 %v1625_v32, %v1625_v32  ;;  %v1626_v34 = vld [vmem:[#allocation34_spill] sm:$0xff] }
  0xc4   :  { %548 = vmatprep.subr.mxu1 %v404_v35  ;;  %v385_v35 = vmul.f32 %v1626_v34, %v1626_v34 }
  0xc6   :  { %478 = vmatpush1.xpose.msra.mxu0 %v339_v36  ;;  %v1627_v36 = vld [vmem:[#allocation35_spill] sm:$0xff] }
  0xc7   :  { %549 = vmatpush1.xpose.msra.mxu1 %v403_v37  ;;  %479 = vmatprep.subr.mxu0 %v338_v38  ;;  %v449_v37 = vmul.f32 %v1627_v36, %v1627_v36  ;;  %v1628_v38 = vld [vmem:[#allocation36_spill] sm:$0xff] }
  0xc8   :  { %550 = vmatprep.subr.mxu1 %v402_v39  ;;  %v384_v39 = vmul.f32 %v1628_v38, %v1628_v38 }
  0xca   :  { %480 = vmatpush1.xpose.msra.mxu0 %v337_v40  ;;  %v1629_v40 = vld [vmem:[#allocation37_spill] sm:$0xff] }
  0xcb   :  { %551 = vmatpush1.xpose.msra.mxu1 %v401_v41  ;;  %481 = vmatprep.subr.mxu0 %v336_v42  ;;  %v448_v41 = vmul.f32 %v1629_v40, %v1629_v40  ;;  %v1630_v42 = vld [vmem:[#allocation38_spill] sm:$0xff] }
  0xcc   :  { %552 = vmatprep.subr.mxu1 %v400_v43  ;;  %v383_v43 = vmul.f32 %v1630_v42, %v1630_v42 }
  0xce   :  { %482 = vmatpush1.xpose.msra.mxu0 %v335_v44  ;;  %v1631_v44 = vld [vmem:[#allocation39_spill] sm:$0xff] }
  0xcf   :  { %553 = vmatpush1.xpose.msra.mxu1 %v399_v45  ;;  %483 = vmatprep.subr.mxu0 %v334_v47  ;;  %v447_v45 = vmul.f32 %v1631_v44, %v1631_v44  ;;  %v1632_v47 = vld [vmem:[#allocation40_spill] sm:$0xff] }
  0xd0   :  { %554 = vmatprep.subr.mxu1 %v398_v48  ;;  %v382_v48 = vmul.f32 %v1632_v47, %v1632_v47 }
  0xd2   :  { %484 = vmatpush1.xpose.msra.mxu0 %v333_v49  ;;  %v1633_v49 = vld [vmem:[#allocation41_spill] sm:$0xff] }
  0xd3   :  { %555 = vmatpush1.xpose.msra.mxu1 %v397_v61  ;;  %485 = vmatprep.subr.mxu0 %v332_v52  ;;  %v446_v50 = vmul.f32 %v1633_v49, %v1633_v49  ;;  %v1634_v61 = vld [vmem:[#allocation42_spill] sm:$0xff]  ;;  %v1635_v52 = vld [vmem:[#allocation43_spill] sm:$0xff] }
  0xd4   :  { %556 = vmatprep.subr.mxu1 %v396_v63  ;;  %v381_v51 = vmul.f32 %v1634_v61, %v1634_v61  ;;  %v445_v62 = vmul.f32 %v1635_v52, %v1635_v52  ;;  %v1636_v63 = vld [vmem:[#allocation44_spill] sm:$0xff] }
  0xd5   :  { %v380_v53 = vmul.f32 %v1636_v63, %v1636_v63 }
  0xd6   :  { %486 = vmatpush1.xpose.msra.mxu0 %v331_v54  ;;  %v1637_v54 = vld [vmem:[#allocation45_spill] sm:$0xff] }
  0xd7   :  { %557 = vmatpush1.xpose.msra.mxu1 %v395_v0  ;;  %487 = vmatprep.subr.mxu0 %v330_v1  ;;  %v444_v46 = vmul.f32 %v1637_v54, %v1637_v54  ;;  %v1638_v0 = vld [vmem:[#allocation46_spill] sm:$0xff]  ;;  %v1639_v1 = vld [vmem:[#allocation47_spill] sm:$0xff] }
  0xd8   :  { %558 = vmatprep.subr.mxu1 %v394_v3  ;;  %v379_v55 = vmul.f32 %v1638_v0, %v1638_v0  ;;  %v443_v2 = vmul.f32 %v1639_v1, %v1639_v1  ;;  %v1640_v3 = vld [vmem:[#allocation48_spill] sm:$0xff] }
  0xd9   :  { %v378_v4 = vmul.f32 %v1640_v3, %v1640_v3  ;;  %v1670_v3 = vld [vmem:[#allocation78_spill] sm:$0xff] }
  0xda   :  { %488 = vmatpush1.xpose.msra.mxu0 %v329_v5  ;;  %v1641_v5 = vld [vmem:[#allocation49_spill] sm:$0xff] }
  0xdb   :  { %559 = vmatpush1.xpose.msra.mxu1 %v393_v7  ;;  %489 = vmatprep.subr.mxu0 %v392_v9  ;;  %v442_v6 = vmul.f32 %v1641_v5, %v1641_v5  ;;  %v1642_v7 = vld [vmem:[#allocation50_spill] sm:$0xff]  ;;  %v1643_v9 = vld [vmem:[#allocation51_spill] sm:$0xff] }
  0xdc   :  { %560 = vmatprep.subr.mxu1 %v456_v11  ;;  %v377_v8 = vmul.f32 %v1642_v7, %v1642_v7  ;;  %v441_v10 = vmul.f32 %v1643_v9, %v1643_v9  ;;  %v1644_v11 = vld [vmem:[#allocation52_spill] sm:$0xff]  ;;  %v1671_v5 = vld [vmem:[#allocation79_spill] sm:$0xff]  ;;  %v361_v9 = vmul.f32 %v1189_v58, %v1189_v58 }
  0xdd   :  { %v376_v12 = vmul.f32 %v1644_v11, %v1644_v11  ;;  %v1672_v7 = vld [vmem:[#allocation80_spill] sm:$0xff] }
  0xde   :  { %490 = vmatpush2.xpose.msra.mxu0 %v391_v13  ;;  %v1645_v13 = vld [vmem:[#allocation53_spill] sm:$0xff] }
  0xdf   :  { %561 = vmatpush2.xpose.msra.mxu1 %v455_v60  ;;  %491 = vmatprep.subr.mxu0 %v390_v15  ;;  %v440_v57 = vmul.f32 %v1645_v13, %v1645_v13  ;;  %v1646_v60 = vld [vmem:[#allocation54_spill] sm:$0xff]  ;;  %v1647_v15 = vld [vmem:[#allocation55_spill] sm:$0xff] }
  0xe0   :  { %562 = vmatprep.subr.mxu1 %v454_v17  ;;  %v375_v14 = vmul.f32 %v1646_v60, %v1646_v60  ;;  %v439_v16 = vmul.f32 %v1647_v15, %v1647_v15  ;;  %v1648_v17 = vld [vmem:[#allocation56_spill] sm:$0xff] }
  0xe1   :  { %v374_v18 = vmul.f32 %v1648_v17, %v1648_v17 }
  0xe2   :  { %492 = vmatpush2.xpose.msra.mxu0 %v389_v19  ;;  %v1649_v19 = vld [vmem:[#allocation57_spill] sm:$0xff] }
  0xe3   :  { %563 = vmatpush2.xpose.msra.mxu1 %v453_v21  ;;  %493 = vmatprep.subr.mxu0 %v388_v23  ;;  %v438_v20 = vmul.f32 %v1649_v19, %v1649_v19  ;;  %v1650_v21 = vld [vmem:[#allocation58_spill] sm:$0xff]  ;;  %v1651_v23 = vld [vmem:[#allocation59_spill] sm:$0xff] }
  0xe4   :  { %564 = vmatprep.subr.mxu1 %v452_v25  ;;  %v373_v22 = vmul.f32 %v1650_v21, %v1650_v21  ;;  %v437_v24 = vmul.f32 %v1651_v23, %v1651_v23  ;;  %v1652_v25 = vld [vmem:[#allocation60_spill] sm:$0xff] }
  0xe5   :  { %v372_v26 = vmul.f32 %v1652_v25, %v1652_v25 }
  0xe6   :  { %494 = vmatpush2.xpose.msra.mxu0 %v387_v27  ;;  %v1653_v27 = vld [vmem:[#allocation61_spill] sm:$0xff] }
  0xe7   :  { %565 = vmatpush2.xpose.msra.mxu1 %v451_v29  ;;  %495 = vmatprep.subr.mxu0 %v386_v31  ;;  %v436_v28 = vmul.f32 %v1653_v27, %v1653_v27  ;;  %v1654_v29 = vld [vmem:[#allocation62_spill] sm:$0xff]  ;;  %v1655_v31 = vld [vmem:[#allocation63_spill] sm:$0xff] }
  0xe8   :  { %566 = vmatprep.subr.mxu1 %v450_v33  ;;  %v371_v30 = vmul.f32 %v1654_v29, %v1654_v29  ;;  %v435_v32 = vmul.f32 %v1655_v31, %v1655_v31  ;;  %v1656_v33 = vld [vmem:[#allocation64_spill] sm:$0xff] }
  0xe9   :  { %v370_v34 = vmul.f32 %v1656_v33, %v1656_v33 }
  0xea   :  { %496 = vmatpush2.xpose.msra.mxu0 %v385_v35  ;;  %v1657_v35 = vld [vmem:[#allocation65_spill] sm:$0xff] }
  0xeb   :  { %567 = vmatpush2.xpose.msra.mxu1 %v449_v37  ;;  %497 = vmatprep.subr.mxu0 %v384_v39  ;;  %v434_v36 = vmul.f32 %v1657_v35, %v1657_v35  ;;  %v1658_v37 = vld [vmem:[#allocation66_spill] sm:$0xff]  ;;  %v1659_v39 = vld [vmem:[#allocation67_spill] sm:$0xff] }
  0xec   :  { %568 = vmatprep.subr.mxu1 %v448_v41  ;;  %v369_v38 = vmul.f32 %v1658_v37, %v1658_v37  ;;  %v433_v40 = vmul.f32 %v1659_v39, %v1659_v39  ;;  %v1660_v41 = vld [vmem:[#allocation68_spill] sm:$0xff] }
  0xed   :  { %v368_v42 = vmul.f32 %v1660_v41, %v1660_v41 }
  0xee   :  { %498 = vmatpush2.xpose.msra.mxu0 %v383_v43  ;;  %v1661_v43 = vld [vmem:[#allocation69_spill] sm:$0xff] }
  0xef   :  { %569 = vmatpush2.xpose.msra.mxu1 %v447_v45  ;;  %499 = vmatprep.subr.mxu0 %v382_v48  ;;  %v432_v44 = vmul.f32 %v1661_v43, %v1661_v43  ;;  %v1662_v45 = vld [vmem:[#allocation70_spill] sm:$0xff]  ;;  %v1663_v48 = vld [vmem:[#allocation71_spill] sm:$0xff] }
  0xf0   :  { %570 = vmatprep.subr.mxu1 %v446_v50  ;;  %v367_v47 = vmul.f32 %v1662_v45, %v1662_v45  ;;  %v431_v49 = vmul.f32 %v1663_v48, %v1663_v48  ;;  %v1664_v50 = vld [vmem:[#allocation72_spill] sm:$0xff] }
  0xf1   :  { %v366_v61 = vmul.f32 %v1664_v50, %v1664_v50 }
  0xf2   :  { %500 = vmatpush2.xpose.msra.mxu0 %v381_v51  ;;  %v1665_v51 = vld [vmem:[#allocation73_spill] sm:$0xff] }
  0xf3   :  { %571 = vmatpush2.xpose.msra.mxu1 %v445_v62  ;;  %501 = vmatprep.subr.mxu0 %v380_v53  ;;  %v430_v52 = vmul.f32 %v1665_v51, %v1665_v51  ;;  %v1666_v62 = vld [vmem:[#allocation74_spill] sm:$0xff]  ;;  %v1667_v53 = vld [vmem:[#allocation75_spill] sm:$0xff] }
  0xf4   :  { %572 = vmatprep.subr.mxu1 %v444_v46  ;;  %v365_v63 = vmul.f32 %v1666_v62, %v1666_v62  ;;  %v429_v54 = vmul.f32 %v1667_v53, %v1667_v53  ;;  %v1668_v46 = vld [vmem:[#allocation76_spill] sm:$0xff] }
  0xf5   :  { %v364_v0 = vmul.f32 %v1668_v46, %v1668_v46 }
  0xf6   :  { %502 = vmatpush2.xpose.msra.mxu0 %v379_v55  ;;  %v1669_v55 = vld [vmem:[#allocation77_spill] sm:$0xff] }
  0xf7   :  { %573 = vmatpush2.xpose.msra.mxu1 %v443_v2  ;;  %503 = vmatprep.subr.mxu0 %v378_v4  ;;  %v428_v1 = vmul.f32 %v1669_v55, %v1669_v55  ;;  %v363_v2 = vmul.f32 %v1173_v59, %v1173_v59  ;;  %v427_v4 = vmul.f32 %v1670_v3, %v1670_v3 }
  0xf8   :  { %574 = vmatprep.subr.mxu1 %v442_v6  ;;  %v362_v6 = vmul.f32 %v1671_v5, %v1671_v5 }
  0xfa   :  { %504 = vmatpush2.xpose.msra.mxu0 %v377_v8  ;;  %v426_v8 = vmul.f32 %v1672_v7, %v1672_v7 }
  0xfb   :  { %575 = vmatpush2.xpose.msra.mxu1 %v441_v10  ;;  %505 = vmatprep.subr.mxu0 %v376_v12  ;;  %v1673_v10 = vld [vmem:[#allocation81_spill] sm:$0xff] }
  0xfc   :  { %576 = vmatprep.subr.mxu1 %v440_v57  ;;  %v425_v11 = vmul.f32 %v1673_v10, %v1673_v10 }
  0xfe   :  { %506 = vmatpush2.xpose.msra.mxu0 %v375_v14 }
  0xff   :  { %577 = vmatpush2.xpose.msra.mxu1 %v439_v16  ;;  %507 = vmatprep.subr.mxu0 %v374_v18 }
 0x100   :  { %578 = vmatprep.subr.mxu1 %v438_v20  ;;  %v777_v20 = vmov 1966171168  }
 0x101   :  { %v611_v21 = vunpack.c.l.s4 %v777_v20 }
 0x102   :  { %508 = vmatpush2.xpose.msra.mxu0 %v373_v22  ;;  %v613_v22 = vlaneseq }
 0x103   :  { %579 = vmatpush2.xpose.msra.mxu1 %v437_v24  ;;  %509 = vmatprep.subr.mxu0 %v372_v26 }
 0x104   :  { %580 = vmatprep.subr.mxu1 %v436_v28  ;;  %v614_v23 = vshrl.u32 %v613_v22, 7 }
 0x106   :  { %510 = vmatpush2.xpose.msra.mxu0 %v371_v30  ;;  %v637_v35 = vsub.s32 0, %v614_v23  ;;  %v641_v37 = vsub.s32 1, %v614_v23  ;;  %v649_v39 = vsub.s32 3, %v614_v23 }
 0x107   :  { %581 = vmatpush2.xpose.msra.mxu1 %v435_v32  ;;  %511 = vmatprep.subr.mxu0 %v370_v34  ;;  %v603_v34 = vld [vmem:[%s1459_s2] sm:$0xf]  ;;  %s746_s2 = scalar_lea.vmem %s677_s25, 1024 }
 0x108   :  { %582 = vmatprep.subr.mxu1 %v434_v36  ;;  %p747_p10 = scmp.ne.s32.totalorder %s677_s25, %s746_s2  ;;  %p752_p12 = scmp.lt.s32.totalorder %s746_s2, %s746_s2 }
 0x10a   :  { %512 = vmatpush2.xpose.msra.mxu0 %v369_v38  ;;  %v645_v38 = vsub.s32 2, %v614_v23  ;;  %p753_p13 = por %p752_p12, %p751_p11 }
 0x10b   :  { %583 = vmatpush2.xpose.msra.mxu1 %v433_v40  ;;  %513 = vmatprep.subr.mxu0 %v368_v42 }
 0x10c   :  { %584 = vmatprep.subr.mxu1 %v432_v44  ;;  %p754_p0 = pnand %p753_p13, %p747_p10 }
 0x10e   :  { %514 = vmatpush2.xpose.msra.mxu0 %v367_v47 }
 0x10f   :  { %585 = vmatpush2.xpose.msra.mxu1 %v431_v49  ;;  %515 = vmatprep.subr.mxu0 %v366_v61 }
 0x110   :  { %586 = vmatprep.subr.mxu1 %v430_v52 }
 0x112   :  { %516 = vmatpush2.xpose.msra.mxu0 %v365_v63 }
 0x113   :  { %587 = vmatpush2.xpose.msra.mxu1 %v429_v54  ;;  %517 = vmatprep.subr.mxu0 %v364_v0 }
 0x114   :  { %588 = vmatprep.subr.mxu1 %v428_v1 }
 0x116   :  { %518 = vmatpush2.xpose.msra.mxu0 %v363_v2 }
 0x117   :  { %589 = vmatpush2.xpose.msra.mxu1 %v427_v4  ;;  %519 = vmatprep.subr.mxu0 %v362_v6 }
 0x118   :  { %590 = vmatprep.subr.mxu1 %v426_v8 }
 0x11a   :  { %520 = vmatpush2.xpose.msra.mxu0 %v361_v9 }
 0x11b   :  { %591 = vmatpush2.xpose.msra.mxu1 %v425_v11 }
 0x11d   :  { %522 = vmatmul.mubr.f32.vlgmr.msra.gmra.mxu0 %v776_v56 }
 0x11e   :  { %593 = vmatmul.mubr.f32.vlgmr.msra.gmra.mxu1 %v776_v56  ;;  %v612_v56 = vunpack.c.0.s8 %v611_v21 }
 0x120   :  { %v615_v26 = vsub.s32 %v612_v56, %v614_v23 }
 0x15d   :  { %v241_v59 = vpop.f32.mrf.mxu0 }
 0x15e   :  { %v318_v12 = vpop.f32.mrf.mxu1 }
 0x15f   :  { %v243_v13 = vpop.f32.mrf.mxu0 }
 0x160   :  { %v320_v57 = vpop.f32.mrf.mxu1 }
 0x161   :  { %v247_v60 = vpop.f32.mrf.mxu0 }
 0x162   :  { %v324_v14 = vpop.f32.mrf.mxu1 }
 0x163   :  { %v249_v58 = vpop.f32.mrf.mxu0 }
 0x164   :  { %v326_v15 = vpop.f32.mrf.mxu1 }
 0x1dd   :  { %v523_v16 = vpop.f32.mrf.mxu0 }
 0x1de   :  { %v594_v17 = vpop.f32.mrf.mxu1  ;;  %698 = vrsqrt.f32 %v523_v16 }
 0x1df   :  { %700 = vrsqrt.f32 %v594_v17  ;;  %v525_v18 = vpop.f32.mrf.mxu0 }
 0x1e0   :  { %v596_v19 = vpop.f32.mrf.mxu1  ;;  %702 = vrsqrt.f32 %v525_v18 }
 0x1e1   :  { %704 = vrsqrt.f32 %v596_v19 }
 0x1eb   :  { %v699_v24 = vpop.eup %698 }
 0x1ec   :  { %v701_v25 = vpop.eup %700 }
 0x1ed   :  { %v703_v27 = vpop.eup %702 }
 0x1ee   :  { %v705_v28 = vpop.eup %704  ;;  %v608_v29 = vcombine.low %v699_v24, %v703_v27 }
 0x1ef   :  { %v609_v30 = vcombine.low %v701_v25, %v705_v28 }
 0x1f0   :  { %v616_v31 = vrot.slane %v608_v29, %v615_v26 }
 0x1f1   :  { %v623_v32 = vrot.slane %v609_v30, %v615_v26 }
 0x1f3   :  { %v624_v33 = vcombine.low %v616_v31, %v623_v32 }
 0x1f5   :  { %v631_v36 = vrot.slane %v624_v33, %v615_v26 }
 0x1f7   :  { %v633_v40 = vmul.f32 %v631_v36, %v603_v34 }
 0x1f9   :  { %v638_v41 = vrot.slane %v633_v40, %v637_v35  ;;  %v642_v42 = vrot.slane %v633_v40, %v641_v37  ;;  %v646_v43 = vrot.slane %v633_v40, %v645_v38  ;;  %v650_v44 = vrot.slane %v633_v40, %v649_v39 }
 0x1fb   :  { %v655_v45 = vmul.f32 %v638_v41, %v241_v59  ;;  %v656_v47 = vmul.f32 %v642_v42, %v243_v13  ;;  %v657_v48 = vmul.f32 %v646_v43, %v318_v12  ;;  %v658_v49 = vmul.f32 %v650_v44, %v320_v57 }
 0x1fc   :  { %v659_v50 = vmul.f32 %v638_v41, %v247_v60  ;;  %v660_v61 = vmul.f32 %v642_v42, %v249_v58  ;;  %v661_v51 = vmul.f32 %v646_v43, %v324_v14  ;;  %v662_v52 = vmul.f32 %v650_v44, %v326_v15 }
 0x1fd   :  { %663 = vst [vmem:[#allocation7] sm:$0xff] %v655_v45  ;;  %664 = vst [vmem:[#allocation7 + $0x8] sm:$0xff] %v656_v47 }
 0x1fe   :  { %665 = vst [vmem:[#allocation7 + $0x10] sm:$0xff] %v657_v48  ;;  %666 = vst [vmem:[#allocation7 + $0x18] sm:$0xff] %v658_v49 }
 0x1ff   :  { %667 = vst [vmem:[#allocation7 + $0x20] sm:$0xff] %v659_v50  ;;  %668 = vst [vmem:[#allocation7 + $0x28] sm:$0xff] %v660_v61 }
 0x200   :  { %669 = vst [vmem:[#allocation7 + $0x30] sm:$0xff] %v661_v51  ;;  %670 = vst [vmem:[#allocation7 + $0x38] sm:$0xff] %v662_v52 }
 0x201   :  { %757 = shalt.err (!%p754_p0)
}
 0x202   :  { %s779_s26 = smov 512   ;;  %s780_s27 = smov 32  }
 0x203   :  { %682 = dma.vmem_to_hbm [thread:$0]  %s677_s25, 1024, %s1460_s3, [#allocation4], %s779_s26, %s779_s26, %s780_s27  }
 0x204   :  { %770 = dma.done.wait [#allocation4], 1024  }
 0x205   :  { %771 = vsyncadd [#allocation4], 4294966272 }
 0x206   :  { %686 = vsyncpa [#allocation3], 1 }
 0x207   :  { %687 = vsyncpa [#allocation6], 1 }
 0x208   :  { %688 = vsyncpa [#allocation4], 1 }

</bundles_post_ra>
